<compile_context>
chip_gen: v7x
topology: tpu7x:2x2x1
jax: 0.10.0
libtpu: 0.0.40
codegen_flags: <defaults>
</compile_context>

<pallas_src>
from typing import NamedTuple, Optional, Tuple

import numpy as np
import jax
import jax.numpy as jnp
from jax.experimental import pallas as pl
from jax.experimental.pallas import tpu as pltpu


class RayBundle(NamedTuple):
    origins: jnp.ndarray          # (N, 3)
    directions: jnp.ndarray       # (N, 3)
    image_size: Tuple[int, int]
    sample_points: Optional[jnp.ndarray] = None   # (N, P, 3)
    sample_lengths: Optional[jnp.ndarray] = None  # (N, P, 1)


class SamplerCfg(NamedTuple):
    n_pts_per_ray: int
    min_depth: float
    max_depth: float


def _sampler_kernel(z_ref, dirs_ref, orig_ref, pts_ref):
    # z_ref:    VMEM (P, 1)       depth column (sublane axis = depth samples)
    # dirs_ref: VMEM (1, 3*Nt)    xyz-interleaved directions for this ray tile
    # orig_ref: VMEM (1, 3*Nt)    xyz-interleaved origins    for this ray tile
    # pts_ref:  VMEM (P, 3*Nt)    out[p, 3*n + c] = orig[n, c] + dir[n, c] * z[p]
    pts_ref[...] = orig_ref[...] + dirs_ref[...] * z_ref[...]


def _choose_ray_tile(n_rays: int, n_pts: int) -> int:
    """Rays per grid step (lane width per step = 3 * tile, f32)."""
    if n_rays % 128 != 0:
        return n_rays                               # full-extent fallback (small N)
    target_elems = (2 * 1024 * 1024) // 4           # ~2 MiB output block per step
    tile = target_elems // max(3 * n_pts, 1)
    tile = max(128, min(n_rays, (tile // 128) * 128))
    tile = min(tile, 8192)                          # keep input sublane-padding bounded
    while n_rays % tile != 0:                       # terminates: n_rays % 128 == 0
        tile -= 128
    return tile


def stratified_raysampler(ray_bundle: RayBundle, cfg: SamplerCfg, *, n_tile=None) -> RayBundle:
    directions = ray_bundle.directions.astype(jnp.float32)   # (N, 3)
    origins = ray_bundle.origins.astype(jnp.float32)         # (N, 3)
    N = directions.shape[0]
    P = cfg.n_pts_per_ray

    z_vals = jnp.linspace(cfg.min_depth, cfg.max_depth, P).astype(jnp.float32)  # (P,)

    if n_tile is None:
        tile = _choose_ray_tile(N, P)
    else:
        tile = int(n_tile)
        assert N % tile == 0 and (tile == N or tile % 128 == 0), \
            "n_tile must divide N and be a multiple of 128 (or equal N)"

    # Glue (cheap relative to the P*N*3 output): interleaved xyz lives on lanes.
    dirs_flat = directions.reshape(1, 3 * N)   # (1, 3N): [x0,y0,z0,x1,y1,z1,...]
    orig_flat = origins.reshape(1, 3 * N)
    z_col = z_vals.reshape(P, 1)               # (P, 1)

    n_blocks = N // tile

    pts2d = pl.pallas_call(
        _sampler_kernel,
        out_shape=jax.ShapeDtypeStruct((P, 3 * N), jnp.float32),
        grid=(n_blocks,),
        in_specs=[
            pl.BlockSpec((P, 1), lambda i: (0, 0)),           # z column (resident)
            pl.BlockSpec((1, 3 * tile), lambda i: (0, i)),    # directions tile
            pl.BlockSpec((1, 3 * tile), lambda i: (0, i)),    # origins tile
        ],
        out_specs=pl.BlockSpec((P, 3 * tile), lambda i: (0, i)),
        compiler_params=pltpu.CompilerParams(
            dimension_semantics=("parallel",),
            vmem_limit_bytes=32 * 1024 * 1024,
        ),
    )(z_col, dirs_flat, orig_flat)

    # (P, 3N) row-major == the torch (P, N, 3) buffer; .view(-1, P, 3) is a reshape.
    sample_points = pts2d.reshape(N, P, 3)
    # sample_lengths is a pure broadcast of z_vals -- produced outside the kernel.
    sample_lengths = jnp.broadcast_to(z_vals[None, :, None], (N, P, 1))

    return ray_bundle._replace(sample_points=sample_points,
                               sample_lengths=sample_lengths)


def _reference(ray_bundle: RayBundle, cfg: SamplerCfg):
    # pure-JAX mirror of the PyTorch code (correctness check)
    P = cfg.n_pts_per_ray
    N = ray_bundle.directions.shape[0]
    z = jnp.linspace(cfg.min_depth, cfg.max_depth, P).astype(jnp.float32)
    pts = ray_bundle.origins[None] + ray_bundle.directions[None] * z[:, None, None]
    sample_points = pts.reshape(N, P, 3)            # torch .view(-1, P, 3)
    sample_lengths = jnp.broadcast_to(z[None, :, None], (N, P, 1))
    return sample_points, sample_lengths


if __name__ == "__main__":
    # deterministic small problem: 32x32 image -> N = 1024 rays, 8 samples per ray
    key = jax.random.PRNGKey(0)
    k1, k2 = jax.random.split(key)
    H, W = 32, 32
    N = H * W
    cfg = SamplerCfg(n_pts_per_ray=8, min_depth=0.1, max_depth=4.0)

    directions = jax.random.normal(k1, (N, 3), dtype=jnp.float32)
    directions = directions / jnp.linalg.norm(directions, axis=-1, keepdims=True)
    origins = jax.random.normal(k2, (N, 3), dtype=jnp.float32) * 0.1

    bundle = RayBundle(origins=origins, directions=directions, image_size=(H, W))
    ref_pts, ref_lens = _reference(bundle, cfg)

    # auto tile (single lane-dense block at this small N)
    out = stratified_raysampler(bundle, cfg)
    jax.block_until_ready(out.sample_points)
    jax.block_until_ready(out.sample_lengths)
    assert out.sample_points.shape == (N, cfg.n_pts_per_ray, 3)
    assert out.sample_lengths.shape == (N, cfg.n_pts_per_ray, 1)
    np.testing.assert_allclose(np.asarray(out.sample_points), np.asarray(ref_pts),
                               rtol=1e-6, atol=1e-6)
    np.testing.assert_allclose(np.asarray(out.sample_lengths), np.asarray(ref_lens),
                               rtol=1e-6, atol=1e-6)

    # explicit small tile to exercise the multi-step (grid > 1) path
    out_tiled = stratified_raysampler(bundle, cfg, n_tile=128)
    jax.block_until_ready(out_tiled.sample_points)
    np.testing.assert_allclose(np.asarray(out_tiled.sample_points), np.asarray(ref_pts),
                               rtol=1e-6, atol=1e-6)

    print("KERNEL_OK")
</pallas_src>

<mosaic_0001>
module attributes {stable_mosaic.version = 11 : i64} {
  func.func @_sampler_kernel(%arg0: i32, %arg1: memref<8x1xf32, #tpu.memory_space<vmem>>, %arg2: memref<1x3072xf32, #tpu.memory_space<vmem>>, %arg3: memref<1x3072xf32, #tpu.memory_space<vmem>>, %arg4: memref<8x3072xf32, #tpu.memory_space<vmem>>) attributes {dimension_semantics = [#tpu.dimension_semantics<parallel>], iteration_bounds = array<i64: 1>, scalar_prefetch = 0 : i64, scratch_operands = 0 : i64, tpu.core_type = #tpu.core_type<tc>, window_params = [{pipeline_mode = #tpu.pipeline_mode<synchronous>, transform_indices = @transform_0, window_bounds = array<i64: 8, 1>}, {transform_indices = @transform_1, window_bounds = array<i64: 1, 3072>}, {transform_indices = @transform_2, window_bounds = array<i64: 1, 3072>}, {transform_indices = @transform_3, window_bounds = array<i64: 8, 3072>}]} {
    %c0 = arith.constant 0 : index
    %c0_0 = arith.constant 0 : index
    %0 = vector.load %arg3[%c0, %c0_0] : memref<1x3072xf32, #tpu.memory_space<vmem>>, vector<1x3072xf32>
    %c0_1 = arith.constant 0 : index
    %c0_2 = arith.constant 0 : index
    %1 = vector.load %arg2[%c0_1, %c0_2] : memref<1x3072xf32, #tpu.memory_space<vmem>>, vector<1x3072xf32>
    %c0_3 = arith.constant 0 : index
    %c0_4 = arith.constant 0 : index
    %2 = vector.load %arg1[%c0_3, %c0_4] : memref<8x1xf32, #tpu.memory_space<vmem>>, vector<8x1xf32>
    %3 = vector.broadcast %1 : vector<1x3072xf32> to vector<8x3072xf32>
    %4 = vector.broadcast %2 : vector<8x1xf32> to vector<8x3072xf32>
    %5 = arith.mulf %3, %4 : vector<8x3072xf32>
    %6 = vector.broadcast %0 : vector<1x3072xf32> to vector<8x3072xf32>
    %7 = arith.addf %6, %5 : vector<8x3072xf32>
    %c0_5 = arith.constant 0 : index
    %c0_6 = arith.constant 0 : index
    %8 = vector.load %arg4[%c0_5, %c0_6] : memref<8x3072xf32, #tpu.memory_space<vmem>>, vector<8x3072xf32>
    tpu.vector_store %arg4[%c0_5, %c0_6], %7 {strides = array<i32>} : memref<8x3072xf32, #tpu.memory_space<vmem>>, vector<8x3072xf32>,
    return
  }
  func.func @transform_0(%arg0: i32) -> (i32, i32) {
    %c0_i32 = arith.constant 0 : i32
    %c0_i32_0 = arith.constant 0 : i32
    %c0_i32_1 = arith.constant 0 : i32
    return %c0_i32, %c0_i32_0 : i32, i32
  }
  func.func @transform_1(%arg0: i32) -> (i32, i32) {
    %c0_i32 = arith.constant 0 : i32
    %c0_i32_0 = arith.constant 0 : i32
    return %c0_i32, %arg0 : i32, i32
  }
  func.func @transform_2(%arg0: i32) -> (i32, i32) {
    %c0_i32 = arith.constant 0 : i32
    %c0_i32_0 = arith.constant 0 : i32
    return %c0_i32, %arg0 : i32, i32
  }
  func.func @transform_3(%arg0: i32) -> (i32, i32) {
    %c0_i32 = arith.constant 0 : i32
    %c0_i32_0 = arith.constant 0 : i32
    return %c0_i32, %arg0 : i32, i32
  }
}

</mosaic_0001>

<bundles_post_ra>
// kernel: tpu_custom_call.1
= control target key start
LH: loop header
LB: loop body
LE: loop exit
PB: predicated region body
PF: predicated region fallthrough
CT: control target
= control target key end

     0   :  { %8 = vsyncpa [#allocation3], 0  ;;  %s649_s0 = inlined_call_operand.vmem [shape: f32[8,1], index: 0, kind: input, shape index: {}]   ;;  %s650_s1 = inlined_call_operand.hbm [shape: f32[1,3072], index: 1, kind: input, shape index: {}]   ;;  %s651_s2 = inlined_call_operand.hbm [shape: f32[1,3072], index: 2, kind: input, shape index: {}]   ;;  %s652_s3 = inlined_call_operand.hbm [shape: f32[8,3072], index: 3, kind: output, shape index: {}]  }
   0x1   :  { %9 = vsyncpa [#allocation6], 0 }
   0x2   :  { %10 = vsyncpa [#allocation4], 0  ;;  %s462_s12 = smov [#allocation2]   ;;  %s463_s14 = smov [#allocation5]  }
   0x3   :  { %s19_s13 = sshll.u32 %s462_s12, 4  ;;  %s29_s15 = sshll.u32 %s463_s14, 4  ;;  %s20_s13 = int_to_ptr.vmem [resolvable:$true] %s19_s13  ;;  %s30_s15 = int_to_ptr.vmem [resolvable:$true] %s29_s15 }
   0x4   :  { %s390_s18 = scalar_lea.hbm %s650_s1, 384 }
   0x5   :  { %p391_p0 = scmp.ne.s32.totalorder %s650_s1, %s390_s18  ;;  %p394_p1 = scmp.lt.u32.totalorder %s390_s18, %s650_s1 }
   0x7   :  { %p396_p2 = pnand %p394_p1, %p391_p0 }
   0x9   :  { %399 = shalt.err (!%p396_p2)
}
   0xa   :  { %s400_s23 = scalar_lea.vmem %s20_s13, 384  ;;  %p405_p4 = scmp.lt.s32.totalorder %s20_s13, %s20_s13 }
   0xb   :  { %p401_p3 = scmp.ne.s32.totalorder %s20_s13, %s400_s23  ;;  %p406_p5 = scmp.lt.s32.totalorder %s400_s23, %s400_s23 }
   0xd   :  { %p407_p6 = por %p406_p5, %p405_p4 }
   0xf   :  { %p408_p7 = pnand %p407_p6, %p401_p3 }
  0x11   :  { %411 = shalt.err (!%p408_p7)
}
  0x12   :  { %22 = dma.hbm_to_vmem [thread:$0]  %s650_s1, 384, %s20_s13, [#allocation3]  }
  0x13   :  { %s412_s28 = scalar_lea.hbm %s651_s2, 384 }
  0x14   :  { %p413_p8 = scmp.ne.s32.totalorder %s651_s2, %s412_s28  ;;  %p416_p9 = scmp.lt.u32.totalorder %s412_s28, %s651_s2 }
  0x16   :  { %p418_p10 = pnand %p416_p9, %p413_p8 }
  0x18   :  { %421 = shalt.err (!%p418_p10)
}
  0x19   :  { %s422_s6 = scalar_lea.vmem %s30_s15, 384  ;;  %p427_p12 = scmp.lt.s32.totalorder %s30_s15, %s30_s15 }
  0x1a   :  { %p423_p11 = scmp.ne.s32.totalorder %s30_s15, %s422_s6  ;;  %p428_p13 = scmp.lt.s32.totalorder %s422_s6, %s422_s6 }
  0x1c   :  { %p429_p0 = por %p428_p13, %p427_p12 }
  0x1e   :  { %p430_p1 = pnand %p429_p0, %p423_p11 }
  0x20   :  { %433 = shalt.err (!%p430_p1)
}
  0x21   :  { %32 = dma.hbm_to_vmem [thread:$0]  %s651_s2, 384, %s30_s15, [#allocation6]  }
  0x22   :  { %456 = dma.done.wait [#allocation3], 384  }
  0x23   :  { %457 = vsyncadd [#allocation3], 4294966912 }
  0x24   :  { %458 = dma.done.wait [#allocation6], 384  }
  0x25   :  { %459 = vsyncadd [#allocation6], 4294966912  ;;  %v464_v0 = vmov 0   ;;  %v45_v1 = vld [vmem:[%s649_s0] sm:$0xff]  ;;  %v49_v2 = vlaneseq  ;;  %v529_v12 = vld [vmem:[#allocation2] sm:$0xff]  ;;  %s465_s0 = smov [#allocation7]  }
  0x26   :  { %389 = vset.pattern.permute.xlu0 %v464_v0  ;;  %v531_v13 = vld [vmem:[#allocation2 + $0x8] sm:$0xff]  ;;  %v541_v18 = vld [vmem:[#allocation2 + $0x10] sm:$0xff]  ;;  %v559_v27 = vld [vmem:[#allocation5] sm:$0xff]  ;;  %s375_s2 = sshll.u32 %s465_s0, 4  ;;  %s376_s2 = int_to_ptr.vmem [resolvable:$true] %s375_s2 }
  0x27   :  { %171 = vperm.xlu0 %389, %v45_v1   ;;  %v50_v3 = vshrl.u32 %v49_v2, 7  ;;  %v577_v36 = vld [vmem:[#allocation5 + $0x8] sm:$0xff]  ;;  %v595_v45 = vld [vmem:[#allocation5 + $0x10] sm:$0xff]  ;;  %s434_s10 = scalar_lea.vmem %s376_s2, 3072  ;;  %p439_p3 = scmp.lt.s32.totalorder %s376_s2, %s376_s2 }
  0x28   :  { %p435_p2 = scmp.ne.s32.totalorder %s376_s2, %s434_s10  ;;  %p440_p4 = scmp.lt.s32.totalorder %s434_s10, %s434_s10 }
  0x29   :  { %v513_v4 = vsub.s32 0, %v50_v3  ;;  %v515_v5 = vsub.s32 1, %v50_v3  ;;  %v517_v6 = vsub.s32 2, %v50_v3  ;;  %v519_v7 = vsub.s32 3, %v50_v3 }
  0x2a   :  { %v521_v8 = vsub.s32 4, %v50_v3  ;;  %v523_v9 = vsub.s32 5, %v50_v3  ;;  %v525_v10 = vsub.s32 6, %v50_v3  ;;  %v527_v11 = vsub.s32 7, %v50_v3  ;;  %p441_p5 = por %p440_p4, %p439_p3 }
  0x2b   :  { %v52_v14 = vrot.slane %v529_v12, %v513_v4  ;;  %v56_v15 = vrot.slane %v529_v12, %v515_v5  ;;  %v60_v16 = vrot.slane %v529_v12, %v517_v6  ;;  %v64_v17 = vrot.slane %v529_v12, %v519_v7 }
  0x2c   :  { %v68_v19 = vrot.slane %v529_v12, %v521_v8  ;;  %v72_v20 = vrot.slane %v529_v12, %v523_v9  ;;  %v76_v21 = vrot.slane %v529_v12, %v525_v10  ;;  %v80_v22 = vrot.slane %v529_v12, %v527_v11  ;;  %p442_p6 = pnand %p441_p5, %p435_p2 }
  0x2d   :  { %v84_v23 = vrot.slane %v531_v13, %v513_v4  ;;  %v88_v24 = vrot.slane %v531_v13, %v515_v5  ;;  %v92_v25 = vrot.slane %v531_v13, %v517_v6  ;;  %v96_v26 = vrot.slane %v531_v13, %v519_v7 }
  0x2e   :  { %v100_v28 = vrot.slane %v531_v13, %v521_v8  ;;  %v104_v29 = vrot.slane %v531_v13, %v523_v9  ;;  %v108_v30 = vrot.slane %v531_v13, %v525_v10  ;;  %v112_v31 = vrot.slane %v531_v13, %v527_v11 }
  0x2f   :  { %v116_v32 = vrot.slane %v541_v18, %v513_v4  ;;  %v120_v33 = vrot.slane %v541_v18, %v515_v5  ;;  %v124_v34 = vrot.slane %v541_v18, %v517_v6  ;;  %v128_v35 = vrot.slane %v541_v18, %v519_v7 }
  0x30   :  { %v132_v37 = vrot.slane %v541_v18, %v521_v8  ;;  %v136_v38 = vrot.slane %v541_v18, %v523_v9  ;;  %v140_v39 = vrot.slane %v541_v18, %v525_v10  ;;  %v144_v40 = vrot.slane %v541_v18, %v527_v11 }
  0x31   :  { %v204_v41 = vrot.slane %v559_v27, %v513_v4  ;;  %v208_v42 = vrot.slane %v559_v27, %v515_v5  ;;  %v212_v43 = vrot.slane %v559_v27, %v517_v6  ;;  %v216_v44 = vrot.slane %v559_v27, %v519_v7 }
  0x32   :  { %v220_v46 = vrot.slane %v559_v27, %v521_v8  ;;  %v224_v47 = vrot.slane %v559_v27, %v523_v9  ;;  %v228_v48 = vrot.slane %v559_v27, %v525_v10  ;;  %v232_v49 = vrot.slane %v559_v27, %v527_v11 }
  0x33   :  { %v236_v50 = vrot.slane %v577_v36, %v513_v4  ;;  %v240_v51 = vrot.slane %v577_v36, %v515_v5  ;;  %v244_v52 = vrot.slane %v577_v36, %v517_v6  ;;  %v248_v53 = vrot.slane %v577_v36, %v519_v7 }
  0x34   :  { %v252_v54 = vrot.slane %v577_v36, %v521_v8  ;;  %v256_v55 = vrot.slane %v577_v36, %v523_v9  ;;  %v260_v56 = vrot.slane %v577_v36, %v525_v10  ;;  %v264_v57 = vrot.slane %v577_v36, %v527_v11 }
  0x35   :  { %v268_v58 = vrot.slane %v595_v45, %v513_v4  ;;  %v272_v59 = vrot.slane %v595_v45, %v515_v5  ;;  %v276_v60 = vrot.slane %v595_v45, %v517_v6  ;;  %v280_v61 = vrot.slane %v595_v45, %v519_v7 }
  0x36   :  { %v284_v63 = vrot.slane %v595_v45, %v521_v8  ;;  %v288_v0 = vrot.slane %v595_v45, %v523_v9  ;;  %v292_v1 = vrot.slane %v595_v45, %v525_v10  ;;  %v296_v2 = vrot.slane %v595_v45, %v527_v11 }
  0xa6   :  { %v172_v62 = vpop.permute.xlu0 %171 }
  0xa7   :  { %v174_v3 = vmul.f32 %v172_v62, %v52_v14  ;;  %v175_v4 = vmul.f32 %v172_v62, %v56_v15  ;;  %v176_v5 = vmul.f32 %v172_v62, %v60_v16  ;;  %v177_v6 = vmul.f32 %v172_v62, %v64_v17 }
  0xa8   :  { %v178_v12 = vmul.f32 %v172_v62, %v68_v19  ;;  %v179_v13 = vmul.f32 %v172_v62, %v72_v20  ;;  %v180_v7 = vmul.f32 %v172_v62, %v76_v21  ;;  %v181_v18 = vmul.f32 %v172_v62, %v80_v22 }
  0xa9   :  { %v182_v27 = vmul.f32 %v172_v62, %v84_v23  ;;  %v183_v36 = vmul.f32 %v172_v62, %v88_v24  ;;  %v184_v8 = vmul.f32 %v172_v62, %v92_v25  ;;  %v185_v9 = vmul.f32 %v172_v62, %v96_v26 }
  0xaa   :  { %v186_v10 = vmul.f32 %v172_v62, %v100_v28  ;;  %v187_v11 = vmul.f32 %v172_v62, %v104_v29  ;;  %v188_v45 = vmul.f32 %v172_v62, %v108_v30  ;;  %v189_v14 = vmul.f32 %v172_v62, %v112_v31 }
  0xab   :  { %v190_v15 = vmul.f32 %v172_v62, %v116_v32  ;;  %v191_v16 = vmul.f32 %v172_v62, %v120_v33  ;;  %v192_v17 = vmul.f32 %v172_v62, %v124_v34  ;;  %v193_v19 = vmul.f32 %v172_v62, %v128_v35 }
  0xac   :  { %v194_v20 = vmul.f32 %v172_v62, %v132_v37  ;;  %v195_v21 = vmul.f32 %v172_v62, %v136_v38  ;;  %v196_v22 = vmul.f32 %v172_v62, %v140_v39  ;;  %v197_v23 = vmul.f32 %v172_v62, %v144_v40 }
  0xad   :  { %v321_v24 = vadd.f32 %v204_v41, %v174_v3  ;;  %v322_v25 = vadd.f32 %v208_v42, %v175_v4  ;;  %v323_v26 = vadd.f32 %v212_v43, %v176_v5  ;;  %v324_v28 = vadd.f32 %v216_v44, %v177_v6 }
  0xae   :  { %v325_v29 = vadd.f32 %v220_v46, %v178_v12  ;;  %v326_v30 = vadd.f32 %v224_v47, %v179_v13  ;;  %v327_v31 = vadd.f32 %v228_v48, %v180_v7  ;;  %v328_v32 = vadd.f32 %v232_v49, %v181_v18 }
  0xaf   :  { %v329_v33 = vadd.f32 %v236_v50, %v182_v27  ;;  %v330_v34 = vadd.f32 %v240_v51, %v183_v36  ;;  %v331_v35 = vadd.f32 %v244_v52, %v184_v8  ;;  %v332_v37 = vadd.f32 %v248_v53, %v185_v9  ;;  %345 = vst [vmem:[#allocation7] sm:$0xff] %v321_v24 }
  0xb0   :  { %346 = vst [vmem:[#allocation7 + $0x8] sm:$0xff] %v322_v25  ;;  %347 = vst [vmem:[#allocation7 + $0x10] sm:$0xff] %v323_v26  ;;  %v333_v38 = vadd.f32 %v252_v54, %v186_v10  ;;  %v334_v39 = vadd.f32 %v256_v55, %v187_v11  ;;  %v335_v40 = vadd.f32 %v260_v56, %v188_v45 }
  0xb1   :  { %348 = vst [vmem:[#allocation7 + $0x18] sm:$0xff] %v324_v28  ;;  %v336_v41 = vadd.f32 %v264_v57, %v189_v14  ;;  %349 = vst [vmem:[#allocation7 + $0x20] sm:$0xff] %v325_v29  ;;  %v337_v42 = vadd.f32 %v268_v58, %v190_v15  ;;  %v338_v43 = vadd.f32 %v272_v59, %v191_v16 }
  0xb2   :  { %350 = vst [vmem:[#allocation7 + $0x28] sm:$0xff] %v326_v30  ;;  %351 = vst [vmem:[#allocation7 + $0x30] sm:$0xff] %v327_v31  ;;  %v339_v44 = vadd.f32 %v276_v60, %v192_v17  ;;  %v340_v46 = vadd.f32 %v280_v61, %v193_v19  ;;  %v341_v47 = vadd.f32 %v284_v63, %v194_v20 }
  0xb3   :  { %352 = vst [vmem:[#allocation7 + $0x38] sm:$0xff] %v328_v32  ;;  %353 = vst [vmem:[#allocation7 + $0x40] sm:$0xff] %v329_v33  ;;  %v342_v48 = vadd.f32 %v288_v0, %v195_v21  ;;  %v343_v49 = vadd.f32 %v292_v1, %v196_v22  ;;  %v344_v50 = vadd.f32 %v296_v2, %v197_v23 }
  0xb4   :  { %354 = vst [vmem:[#allocation7 + $0x48] sm:$0xff] %v330_v34  ;;  %355 = vst [vmem:[#allocation7 + $0x50] sm:$0xff] %v331_v35 }
  0xb5   :  { %356 = vst [vmem:[#allocation7 + $0x58] sm:$0xff] %v332_v37  ;;  %357 = vst [vmem:[#allocation7 + $0x60] sm:$0xff] %v333_v38 }
  0xb6   :  { %358 = vst [vmem:[#allocation7 + $0x68] sm:$0xff] %v334_v39  ;;  %359 = vst [vmem:[#allocation7 + $0x70] sm:$0xff] %v335_v40 }
  0xb7   :  { %360 = vst [vmem:[#allocation7 + $0x78] sm:$0xff] %v336_v41  ;;  %361 = vst [vmem:[#allocation7 + $0x80] sm:$0xff] %v337_v42 }
  0xb8   :  { %362 = vst [vmem:[#allocation7 + $0x88] sm:$0xff] %v338_v43  ;;  %363 = vst [vmem:[#allocation7 + $0x90] sm:$0xff] %v339_v44 }
  0xb9   :  { %364 = vst [vmem:[#allocation7 + $0x98] sm:$0xff] %v340_v46  ;;  %365 = vst [vmem:[#allocation7 + $0xa0] sm:$0xff] %v341_v47 }
  0xba   :  { %366 = vst [vmem:[#allocation7 + $0xa8] sm:$0xff] %v342_v48  ;;  %367 = vst [vmem:[#allocation7 + $0xb0] sm:$0xff] %v343_v49 }
  0xbb   :  { %368 = vst [vmem:[#allocation7 + $0xb8] sm:$0xff] %v344_v50 }
  0xbc   :  { %445 = shalt.err (!%p442_p6)
}
  0xbd   :  { %s446_s13 = scalar_lea.hbm %s652_s3, 3072 }
  0xbe   :  { %p447_p7 = scmp.ne.s32.totalorder %s652_s3, %s446_s13  ;;  %p450_p8 = scmp.lt.u32.totalorder %s446_s13, %s652_s3 }
  0xc0   :  { %p452_p9 = pnand %p450_p8, %p447_p7 }
  0xc2   :  { %455 = shalt.err (!%p452_p9)
}
  0xc3   :  { %378 = dma.vmem_to_hbm [thread:$0]  %s376_s2, 3072, %s652_s3, [#allocation4]  }
  0xc4   :  { %460 = dma.done.wait [#allocation4], 3072  }
  0xc5   :  { %461 = vsyncadd [#allocation4], 4294964224 }
  0xc6   :  { %382 = vsyncpa [#allocation3], 1 }
  0xc7   :  { %383 = vsyncpa [#allocation6], 1 }
  0xc8   :  { %384 = vsyncpa [#allocation4], 1 }

</bundles_post_ra>
